<compile_context>
chip_gen: v7x
topology: tpu7x:2x2x1
jax: 0.10.0
libtpu: 0.0.40
codegen_flags: <defaults>
</compile_context>

<pallas_src>
import functools

import jax
import jax.numpy as jnp
import numpy as np
from jax.experimental import pallas as pl
from jax.experimental.pallas import tpu as pltpu

KERNEL_SIZE = 5  # the module's __init__ arg; Autoformer's moving_avg is odd.


def _decomp_kernel(x_ref, seasonal_ref, trend_ref, *, seg_len, kernel_size):
    pad = kernel_size // 2
    _, w = x_ref.shape
    x = x_ref[...].astype(jnp.float32)          # single up-cast; accumulate in f32

    # Time index of every lane within its packed series segment.  Handles both the
    # packed-row boundaries (G > 1) and the roll wrap-around at the tile edges.
    t = jax.lax.broadcasted_iota(jnp.int32, x.shape, 1) % seg_len

    # Sliding-window sum: k-1 lane rotations (XLU) with static edge masks (VPU).
    # The centre tap (d == 0) is x itself.
    # TODO(synk): for large kernel_size (e.g. Autoformer's 25) switch to a prefix-sum
    # formulation to keep this O(1) ops/element.
    acc = x
    for d in range(-pad, pad + 1):
        if d == 0:
            continue
        shifted = pltpu.roll(x, shift=(-d) % w, axis=1)   # shifted[l] == x[l + d]
        if d > 0:
            valid = t < (seg_len - d)
        else:
            valid = t >= (-d)
        acc = acc + jnp.where(valid, shifted, 0.0)

    # AvgPool1d default count_include_pad=True: always divide by kernel_size.
    trend = acc * (1.0 / kernel_size)
    trend_ref[...] = trend.astype(trend_ref.dtype)
    seasonal_ref[...] = (x - trend).astype(seasonal_ref.dtype)


def _pick_packing(m, seq_len):
    """Largest divisor G of m with G*seq_len <= 128 (lane-dense packed rows)."""
    if seq_len >= 128:
        return 1
    g_max = min(m, max(1, 128 // seq_len))
    for g in range(g_max, 0, -1):
        if m % g == 0:
            return g
    return 1


def _pick_row_tile(mp, w):
    """Rows per grid step for a packed (mp, w) problem."""
    # ~2 MiB per (TM, W) f32 buffer keeps DMA tiles past the ~85%-of-roofline knee
    # while (in + 2 outs) x 2 pipeline buffers + a few f32 temporaries stay around
    # ~20 MiB -- inside the 40 MiB scoped-VMEM request and well under the v7x
    # 64 MiB/TC physical ceiling.
    target_tile_bytes = 2 * 1024 * 1024
    tm = max(8, (target_tile_bytes // (4 * max(w, 1))) // 8 * 8)
    if tm >= mp:
        # Whole problem fits one block.  If there are enough rows, split into two grid
        # steps so v7x can drive both TensorCores (harmless on single-TC v5e/v6e).
        if mp >= 16:
            half = ((-(-mp // 2)) + 7) // 8 * 8
            if half < mp:
                return half
        return mp
    return tm


def series_decomposition(x, kernel_size=KERNEL_SIZE):
    """x: (B, C, L) float array -> (seasonal, trend), both (B, C, L)."""
    assert kernel_size % 2 == 1, "odd kernel_size (length-preserving) case only"
    B, C, L = x.shape
    M = B * C

    # Lane-pack G consecutive rows per packed row (free row-major reshape).
    G = _pick_packing(M, L)
    Mp, W = M // G, G * L
    x2d = x.reshape(Mp, W)

    TM = _pick_row_tile(Mp, W)
    grid = (pl.cdiv(Mp, TM),)

    itemsize = jnp.dtype(x.dtype).itemsize
    cost = pl.CostEstimate(
        flops=(kernel_size + 1) * M * L,        # (k-1) adds + 1 mul + 1 sub per element
        transcendentals=0,
        bytes_accessed=3 * M * L * itemsize,    # read x, write seasonal + trend
    )

    kernel = functools.partial(_decomp_kernel, seg_len=L, kernel_size=kernel_size)

    seasonal, trend = pl.pallas_call(
        kernel,
        grid=grid,
        in_specs=[pl.BlockSpec((TM, W), lambda i: (i, 0))],
        out_specs=[
            pl.BlockSpec((TM, W), lambda i: (i, 0)),
            pl.BlockSpec((TM, W), lambda i: (i, 0)),
        ],
        out_shape=[
            jax.ShapeDtypeStruct((Mp, W), x.dtype),
            jax.ShapeDtypeStruct((Mp, W), x.dtype),
        ],
        compiler_params=pltpu.CompilerParams(
            dimension_semantics=("parallel",),
            vmem_limit_bytes=40 * 1024 * 1024,
        ),
        cost_estimate=cost,
    )(x2d)

    return seasonal.reshape(B, C, L), trend.reshape(B, C, L)


def _reference(x, kernel_size=KERNEL_SIZE):
    # Pure-JAX reference of the PyTorch semantics (zero pad, count_include_pad=True).
    pad = kernel_size // 2
    B, C, L = x.shape
    xpad = jnp.pad(x.astype(jnp.float32), ((0, 0), (0, 0), (pad, pad)))
    trend = jnp.zeros((B, C, L), jnp.float32)
    for j in range(kernel_size):
        trend = trend + xpad[:, :, j:j + L]
    trend = trend / kernel_size
    return (x.astype(jnp.float32) - trend).astype(x.dtype), trend.astype(x.dtype)


if __name__ == "__main__":
    key = jax.random.PRNGKey(0)
    shapes = [
        (2, 4, 16),    # packed path: G=8 rows per 128-lane packed row
        (2, 4, 128),   # unpacked path, single block
        (8, 8, 128),   # unpacked, two grid steps (dual-TC split on v7x)
    ]
    for (B, C, L) in shapes:
        key, sub = jax.random.split(key)
        x = jax.random.normal(sub, (B, C, L), dtype=jnp.float32)

        seasonal, trend = series_decomposition(x)
        jax.block_until_ready((seasonal, trend))

        ref_seasonal, ref_trend = _reference(x)
        np.testing.assert_allclose(np.asarray(trend), np.asarray(ref_trend),
                                   rtol=1e-5, atol=1e-5)
        np.testing.assert_allclose(np.asarray(seasonal), np.asarray(ref_seasonal),
                                   rtol=1e-5, atol=1e-5)

    print("KERNEL_OK")
</pallas_src>

<mosaic_0001>
module attributes {stable_mosaic.version = 11 : i64} {
  func.func @_decomp_kernel(%arg0: i32, %arg1: memref<1x128xf32, #tpu.memory_space<vmem>>, %arg2: memref<1x128xf32, #tpu.memory_space<vmem>>, %arg3: memref<1x128xf32, #tpu.memory_space<vmem>>) attributes {dimension_semantics = [#tpu.dimension_semantics<parallel>], iteration_bounds = array<i64: 1>, scalar_prefetch = 0 : i64, scratch_operands = 0 : i64, tpu.core_type = #tpu.core_type<tc>, window_params = [{transform_indices = @transform_0, window_bounds = array<i64: 1, 128>}, {transform_indices = @transform_1, window_bounds = array<i64: 1, 128>}, {transform_indices = @transform_2, window_bounds = array<i64: 1, 128>}]} {
    %c0 = arith.constant 0 : index
    %c0_0 = arith.constant 0 : index
    %0 = vector.load %arg1[%c0, %c0_0] : memref<1x128xf32, #tpu.memory_space<vmem>>, vector<1x128xf32>
    %1 = tpu.iota {dimensions = array<i32: 1>} : vector<1x128xi32>
    %c16_i32 = arith.constant 16 : i32
    %c0_i32 = arith.constant 0 : i32
    %2 = arith.cmpi eq, %c16_i32, %c0_i32 : i32
    %c1_i32 = arith.constant 1 : i32
    %3 = arith.select %2, %c1_i32, %c16_i32 : i32
    %4 = vector.broadcast %3 : i32 to vector<1x128xi32>
    %5 = arith.remsi %1, %4 : vector<1x128xi32>
    %c0_i32_1 = arith.constant 0 : i32
    %6 = vector.broadcast %c0_i32_1 : i32 to vector<1x128xi32>
    %7 = arith.cmpi ne, %5, %6 : vector<1x128xi32>
    %c0_i32_2 = arith.constant 0 : i32
    %8 = vector.broadcast %c0_i32_2 : i32 to vector<1x128xi32>
    %9 = arith.cmpi slt, %5, %8 : vector<1x128xi32>
    %c0_i32_3 = arith.constant 0 : i32
    %10 = arith.cmpi slt, %3, %c0_i32_3 : i32
    %11 = vector.broadcast %10 : i1 to vector<1x128xi1>
    %12 = vector.broadcast %11 : vector<1x128xi1> to vector<1x128xi1>
    %13 = arith.xori %9, %12 : vector<1x128xi1>
    %14 = arith.andi %13, %7 : vector<1x128xi1>
    %15 = vector.broadcast %3 : i32 to vector<1x128xi32>
    %16 = arith.addi %5, %15 : vector<1x128xi32>
    %17 = arith.select %14, %16, %5 : vector<1x128xi1>, vector<1x128xi32>
    %c2_i32 = arith.constant 2 : i32
    %18 = tpu.dynamic_rotate %0 by %c2_i32 dim 1 : vector<1x128xf32>, i32 -> vector<1x128xf32>
    %c2_i32_4 = arith.constant 2 : i32
    %19 = vector.broadcast %c2_i32_4 : i32 to vector<1x128xi32>
    %20 = arith.cmpi sge, %17, %19 : vector<1x128xi32>
    %cst = arith.constant 0.000000e+00 : f32
    %21 = vector.broadcast %cst : f32 to vector<1x128xf32>
    %22 = arith.select %20, %18, %21 : vector<1x128xi1>, vector<1x128xf32>
    %23 = arith.addf %0, %22 : vector<1x128xf32>
    %c1_i32_5 = arith.constant 1 : i32
    %24 = tpu.dynamic_rotate %0 by %c1_i32_5 dim 1 : vector<1x128xf32>, i32 -> vector<1x128xf32>
    %c1_i32_6 = arith.constant 1 : i32
    %25 = vector.broadcast %c1_i32_6 : i32 to vector<1x128xi32>
    %26 = arith.cmpi sge, %17, %25 : vector<1x128xi32>
    %cst_7 = arith.constant 0.000000e+00 : f32
    %27 = vector.broadcast %cst_7 : f32 to vector<1x128xf32>
    %28 = arith.select %26, %24, %27 : vector<1x128xi1>, vector<1x128xf32>
    %29 = arith.addf %23, %28 : vector<1x128xf32>
    %c127_i32 = arith.constant 127 : i32
    %30 = tpu.dynamic_rotate %0 by %c127_i32 dim 1 : vector<1x128xf32>, i32 -> vector<1x128xf32>
    %c15_i32 = arith.constant 15 : i32
    %31 = vector.broadcast %c15_i32 : i32 to vector<1x128xi32>
    %32 = arith.cmpi slt, %17, %31 : vector<1x128xi32>
    %cst_8 = arith.constant 0.000000e+00 : f32
    %33 = vector.broadcast %cst_8 : f32 to vector<1x128xf32>
    %34 = arith.select %32, %30, %33 : vector<1x128xi1>, vector<1x128xf32>
    %35 = arith.addf %29, %34 : vector<1x128xf32>
    %c126_i32 = arith.constant 126 : i32
    %36 = tpu.dynamic_rotate %0 by %c126_i32 dim 1 : vector<1x128xf32>, i32 -> vector<1x128xf32>
    %c14_i32 = arith.constant 14 : i32
    %37 = vector.broadcast %c14_i32 : i32 to vector<1x128xi32>
    %38 = arith.cmpi slt, %17, %37 : vector<1x128xi32>
    %cst_9 = arith.constant 0.000000e+00 : f32
    %39 = vector.broadcast %cst_9 : f32 to vector<1x128xf32>
    %40 = arith.select %38, %36, %39 : vector<1x128xi1>, vector<1x128xf32>
    %41 = arith.addf %35, %40 : vector<1x128xf32>
    %cst_10 = arith.constant 2.000000e-01 : f32
    %42 = vector.broadcast %cst_10 : f32 to vector<1x128xf32>
    %43 = arith.mulf %41, %42 : vector<1x128xf32>
    %c0_11 = arith.constant 0 : index
    %c0_12 = arith.constant 0 : index
    %44 = vector.load %arg3[%c0_11, %c0_12] : memref<1x128xf32, #tpu.memory_space<vmem>>, vector<1x128xf32>
    tpu.vector_store %arg3[%c0_11, %c0_12], %43 {strides = array<i32>} : memref<1x128xf32, #tpu.memory_space<vmem>>, vector<1x128xf32>,
    %45 = arith.subf %0, %43 : vector<1x128xf32>
    %c0_13 = arith.constant 0 : index
    %c0_14 = arith.constant 0 : index
    %46 = vector.load %arg2[%c0_13, %c0_14] : memref<1x128xf32, #tpu.memory_space<vmem>>, vector<1x128xf32>
    tpu.vector_store %arg2[%c0_13, %c0_14], %45 {strides = array<i32>} : memref<1x128xf32, #tpu.memory_space<vmem>>, vector<1x128xf32>,
    return
  }
  func.func @transform_0(%arg0: i32) -> (i32, i32) {
    %c0_i32 = arith.constant 0 : i32
    %c0_i32_0 = arith.constant 0 : i32
    return %arg0, %c0_i32 : i32, i32
  }
  func.func @transform_1(%arg0: i32) -> (i32, i32) {
    %c0_i32 = arith.constant 0 : i32
    %c0_i32_0 = arith.constant 0 : i32
    return %arg0, %c0_i32 : i32, i32
  }
  func.func @transform_2(%arg0: i32) -> (i32, i32) {
    %c0_i32 = arith.constant 0 : i32
    %c0_i32_0 = arith.constant 0 : i32
    return %arg0, %c0_i32 : i32, i32
  }
}

</mosaic_0001>

<bundles_post_ra>
// kernel: tpu_custom_call.1
= control target key start
LH: loop header
LB: loop body
LE: loop exit
PB: predicated region body
PF: predicated region fallthrough
CT: control target
= control target key end

     0   :  { %8 = vsyncpa [#allocation3], 0  ;;  %s237_s0 = inlined_call_operand.hbm [shape: f32[1,128], index: 0, kind: input, shape index: {}]   ;;  %s238_s1 = inlined_call_operand.hbm [shape: f32[1,128], index: 1, kind: output, shape index: {0}]   ;;  %s239_s2 = inlined_call_operand.hbm [shape: f32[1,128], index: 2, kind: output, shape index: {1}]  }
   0x1   :  { %9 = vsyncpa [#allocation4], 0 }
   0x2   :  { %10 = vsyncpa [#allocation7], 0  ;;  %s171_s9 = smov [#allocation2]   ;;  %s99_s13 = scalar_lea.hbm %s237_s0, 16 }
   0x3   :  { %s17_s10 = sshll.u32 %s171_s9, 4  ;;  %p100_p0 = scmp.ne.s32.totalorder %s237_s0, %s99_s13  ;;  %s18_s10 = int_to_ptr.vmem [resolvable:$true] %s17_s10 }
   0x4   :  { %p103_p1 = scmp.lt.u32.totalorder %s99_s13, %s237_s0 }
   0x6   :  { %p105_p2 = pnand %p103_p1, %p100_p0 }
   0x8   :  { %108 = shalt.err (!%p105_p2)
}
   0x9   :  { %s109_s18 = scalar_lea.vmem %s18_s10, 16  ;;  %s113_s19 = scalar_lea.vmem %s18_s10, 32 }
   0xa   :  { %p110_p3 = scmp.ne.s32.totalorder %s18_s10, %s109_s18  ;;  %p114_p4 = scmp.lt.s32.totalorder %s18_s10, %s18_s10 }
   0xb   :  { %p115_p5 = scmp.lt.s32.totalorder %s113_s19, %s109_s18 }
   0xd   :  { %p116_p6 = por %p115_p5, %p114_p4 }
   0xf   :  { %p117_p7 = pnand %p116_p6, %p110_p3 }
  0x11   :  { %120 = shalt.err (!%p117_p7)
}
  0x12   :  { %20 = dma.hbm_to_vmem [thread:$0]  %s237_s0, 16, %s18_s10, [#allocation3]  }
  0x13   :  { %165 = dma.done.wait [#allocation3], 16  }
  0x14   :  { %166 = vsyncadd [#allocation3], 4294967280  ;;  %v24_v0 = vld [vmem:[#allocation2] sm:$0x1]  ;;  %s172_s22 = smov 2   ;;  %s173_s23 = smov 127   ;;  %v25_v1 = vlaneseq }
  0x15   :  { %39 = vrot.lane.b32.xlu0 %v24_v0, %s172_s22  ;;  %49 = vrot.lane.b32.xlu1 %v24_v0, %s173_s23  ;;  %s174_s24 = smov 1   ;;  %s175_s25 = smov 126  }
  0x16   :  { %v26_v2 = vand.u32 127, %v25_v1  ;;  %s176_s0 = smov [#allocation6]   ;;  %s177_s27 = smov [#allocation5]  }
  0x17   :  { %s79_s26 = sshll.u32 %s176_s0, 4  ;;  %s69_s28 = sshll.u32 %s177_s27, 4  ;;  %s80_s26 = int_to_ptr.vmem [resolvable:$true] %s79_s26  ;;  %s205_s28 = int_to_ptr.vmem [resolvable:$true] %s69_s28 }
  0x18   :  { %v31_v3 = vand.u32 15, %v26_v2  ;;  %s121_s29 = scalar_lea.vmem %s80_s26, 16  ;;  %s125_s30 = scalar_lea.vmem %s80_s26, 32 }
  0x19   :  { %44 = vrot.lane.b32.xlu0 %v24_v0, %s174_s24  ;;  %54 = vrot.lane.b32.xlu1 %v24_v0, %s175_s25  ;;  %p122_p8 = scmp.ne.s32.totalorder %s80_s26, %s121_s29  ;;  %p126_p9 = scmp.lt.s32.totalorder %s80_s26, %s80_s26 }
  0x1a   :  { %vm41_vm0 = vcmp.ge.s32.totalorder %v31_v3, 2  ;;  %vm46_vm1 = vcmp.ge.s32.totalorder %v31_v3, 1  ;;  %vm51_vm2 = vcmp.lt.s32.totalorder %v31_v3, 15  ;;  %vm56_vm3 = vcmp.lt.s32.totalorder %v31_v3, 14  ;;  %p127_p10 = scmp.lt.s32.totalorder %s125_s30, %s121_s29 }
  0x1c   :  { %p128_p11 = por %p127_p10, %p126_p9 }
  0x1e   :  { %p129_p12 = pnand %p128_p11, %p122_p8 }
  0x87   :  { %v40_v4 = vpop.permute.xlu0 %39  ;;  %v50_v5 = vpop.permute.xlu1 %49 }
  0x88   :  { %v42_v6 = vsel %vm41_vm0, %v40_v4, 0.0  ;;  %v52_v12 = vsel %vm51_vm2, %v50_v5, 0.0 }
  0x89   :  { %v43_v7 = vadd.f32 %v42_v6, %v24_v0 }
  0x8b   :  { %v45_v8 = vpop.permute.xlu0 %44  ;;  %v55_v9 = vpop.permute.xlu1 %54 }
  0x8c   :  { %v47_v10 = vsel %vm46_vm1, %v45_v8, 0.0  ;;  %v57_v13 = vsel %vm56_vm3, %v55_v9, 0.0 }
  0x8d   :  { %v48_v11 = vadd.f32 %v47_v10, %v43_v7 }
  0x8f   :  { %v53_v14 = vadd.f32 %v52_v12, %v48_v11 }
  0x91   :  { %v58_v15 = vadd.f32 %v57_v13, %v53_v14 }
  0x93   :  { %v59_v16 = vmul.f32 0.2, %v58_v15 }
  0x95   :  { %60 = vst [vmem:[#allocation6] sm:$0x1] %v59_v16  ;;  %v61_v17 = vsub.f32 %v24_v0, %v59_v16 }
  0x96   :  { %132 = shalt.err (!%p129_p12)
}
  0x97   :  { %s133_s5 = scalar_lea.hbm %s239_s2, 16 }
  0x98   :  { %p134_p13 = scmp.ne.s32.totalorder %s239_s2, %s133_s5  ;;  %p137_p0 = scmp.lt.u32.totalorder %s133_s5, %s239_s2 }
  0x9a   :  { %p139_p1 = pnand %p137_p0, %p134_p13 }
  0x9c   :  { %142 = shalt.err (!%p139_p1)
}
  0x9d   :  { %82 = dma.vmem_to_hbm [thread:$0]  %s80_s26, 16, %s239_s2, [#allocation7]   ;;  %62 = vst [vmem:[#allocation5] sm:$0x1] %v61_v17 }
  0x9e   :  { %s143_s12 = scalar_lea.vmem %s205_s28, 16  ;;  %s147_s13 = scalar_lea.vmem %s205_s28, 32 }
  0x9f   :  { %p144_p2 = scmp.ne.s32.totalorder %s205_s28, %s143_s12  ;;  %p148_p3 = scmp.lt.s32.totalorder %s205_s28, %s205_s28 }
  0xa0   :  { %p149_p4 = scmp.lt.s32.totalorder %s147_s13, %s143_s12 }
  0xa2   :  { %p150_p5 = por %p149_p4, %p148_p3 }
  0xa4   :  { %p151_p6 = pnand %p150_p5, %p144_p2 }
  0xa6   :  { %154 = shalt.err (!%p151_p6)
}
  0xa7   :  { %s155_s16 = scalar_lea.hbm %s238_s1, 16 }
  0xa8   :  { %p156_p7 = scmp.ne.s32.totalorder %s238_s1, %s155_s16  ;;  %p159_p8 = scmp.lt.u32.totalorder %s155_s16, %s238_s1 }
  0xaa   :  { %p161_p9 = pnand %p159_p8, %p156_p7 }
  0xac   :  { %164 = shalt.err (!%p161_p9)
}
  0xad   :  { %72 = dma.vmem_to_hbm [thread:$0]  %s205_s28, 16, %s238_s1, [#allocation4]  }
  0xae   :  { %167 = dma.done.wait [#allocation4], 16  }
  0xaf   :  { %168 = vsyncadd [#allocation4], 4294967280 }
  0xb0   :  { %169 = dma.done.wait [#allocation7], 16  }
  0xb1   :  { %170 = vsyncadd [#allocation7], 4294967280 }
  0xb2   :  { %89 = vsyncpa [#allocation3], 1 }
  0xb3   :  { %90 = vsyncpa [#allocation4], 1 }
  0xb4   :  { %91 = vsyncpa [#allocation7], 1 }

</bundles_post_ra>
